<compile_context>
chip_gen: v7x
topology: tpu7x:2x2x1
jax: 0.10.0
libtpu: 0.0.40
codegen_flags: <defaults>
</compile_context>

<pallas_src>
from functools import partial

import jax
import jax.numpy as jnp
from jax.experimental import pallas as pl
from jax.experimental.pallas import tpu as pltpu


def _sequence_loss_kernel(gt_ref, valid_ref, *rest, n_preds, gamma, max_flow,
                          inv_count):
    pred_refs = rest[:n_preds]
    out_ref = rest[n_preds]

    # gt tile, upcast to f32 for all accumulation.
    gt = gt_ref[...].astype(jnp.float32)                       # [B,2,TH,W]

    # valid = (valid >= 0.5) & (mag < max_flow), using mag^2 < max_flow^2
    # to avoid the EUP sqrt.
    mag2 = jnp.sum(gt * gt, axis=1, keepdims=True)             # [B,1,TH,W]
    vmask = jnp.logical_and(
        valid_ref[...].astype(jnp.float32) >= 0.5,
        mag2 < jnp.float32(max_flow) * jnp.float32(max_flow),
    ).astype(jnp.float32)                                      # [B,1,TH,W]

    v_sum = jnp.sum(vmask, axis=(0, 1))                        # [TH, W]

    # Accumulate the gamma-weighted per-pixel L1 map across predictions;
    # single cross-lane reduction afterwards.
    th, w = v_sum.shape
    l_weighted = jnp.zeros((th, w), dtype=jnp.float32)
    for i in range(n_preds):                                   # static unroll
        i_weight = jnp.float32(float(gamma) ** (n_preds - 1 - i))
        diff = jnp.abs(pred_refs[i][...].astype(jnp.float32) - gt)  # [B,2,TH,W]
        l_weighted = l_weighted + i_weight * jnp.sum(diff, axis=(0, 1))

    partial_loss = jnp.sum(v_sum * l_weighted) * jnp.float32(inv_count)
    out_ref[...] = partial_loss.reshape(1, 1, 1)


def _choose_tile_h(h, w, b, n_preds, itemsize, budget_bytes):
    """Largest H-tile whose double-buffered input slabs fit the budget.

    Only returns H itself or a multiple-of-8 divisor of H so the (8,128)
    block constraint and even tiling are always satisfied.
    """
    # "channel rows" per H row across all inputs: Np preds (B*2) + gt (B*2) + valid (B*1)
    chan_rows = b * (2 * n_preds + 2 + 1)

    def tile_bytes(th):
        return 2 * chan_rows * th * w * itemsize   # x2: double buffering

    if tile_bytes(h) <= budget_bytes:
        return h
    best = None
    for th in range(8, h, 8):
        if h % th == 0 and tile_bytes(th) <= budget_bytes:
            best = th
    if best is not None:
        return best
    for th in range(8, h, 8):                      # smallest legal tile
        if h % th == 0:
            return th
    return h                                       # H has no mult-of-8 divisor


def sequence_loss(flow_preds, flows, valids, *, gamma, max_flow, tile_h=None):
    """Pallas implementation of SequenceLoss.forward.

    flow_preds: sequence of [B, 2, H, W] arrays (native dtype, e.g. bf16/f32)
    flows     : [B, N, 2, H, W]
    valids    : [B, N, 1, H, W]
    Returns a float32 scalar.
    """
    flow_gt = flows[:, 0]                          # [B, 2, H, W], native dtype
    valid = valids[:, 0]                           # [B, 1, H, W], native dtype
    n_preds = len(flow_preds)
    B, C, H, W = flow_gt.shape
    assert C == 2

    itemsize = max([flow_gt.dtype.itemsize, valid.dtype.itemsize]
                   + [p.dtype.itemsize for p in flow_preds])
    if tile_h is None:
        # ~10 MiB of double-buffered input slabs: fits v5e/v6e/v7x scoped VMEM
        # with headroom for in-kernel f32 temporaries.
        tile_h = _choose_tile_h(H, W, B, n_preds, itemsize, budget_bytes=10 << 20)
    assert H % tile_h == 0 and (tile_h == H or tile_h % 8 == 0), \
        "tile_h must divide H and be a multiple of 8 (or equal H)"
    num_tiles = H // tile_h

    inv_count = 1.0 / float(B * B * C * H * W)     # FULL logical dims

    gt_spec = pl.BlockSpec((B, C, tile_h, W), lambda i: (0, 0, i, 0))
    valid_spec = pl.BlockSpec((B, 1, tile_h, W), lambda i: (0, 0, i, 0))
    pred_spec = pl.BlockSpec((B, C, tile_h, W), lambda i: (0, 0, i, 0))
    out_spec = pl.BlockSpec((1, 1, 1), lambda i: (i, 0, 0))

    kernel = partial(_sequence_loss_kernel, n_preds=n_preds, gamma=gamma,
                     max_flow=max_flow, inv_count=inv_count)

    bytes_accessed = (flow_gt.nbytes + valid.nbytes
                      + sum(int(p.nbytes) for p in flow_preds)
                      + num_tiles * 4)
    flops = (3 * n_preds * B * C * H * W   # sub/abs/add per pred element
             + 4 * B * C * H * W           # mag^2 + mask math
             + 3 * B * H * W)              # v_sum, v*l, final reduce (approx)

    partials = pl.pallas_call(
        kernel,
        out_shape=jax.ShapeDtypeStruct((num_tiles, 1, 1), jnp.float32),
        grid_spec=pltpu.PrefetchScalarGridSpec(
            num_scalar_prefetch=0,
            grid=(num_tiles,),
            in_specs=[gt_spec, valid_spec] + [pred_spec] * n_preds,
            out_specs=out_spec,
        ),
        compiler_params=pltpu.CompilerParams(
            dimension_semantics=("parallel",),
            vmem_limit_bytes=32 << 20,
        ),
        cost_estimate=pl.CostEstimate(flops=flops, transcendentals=0,
                                      bytes_accessed=bytes_accessed),
    )(flow_gt, valid, *flow_preds)

    # Combine per-tile partials (tiny; also merges v7x per-core partials).
    return jnp.sum(partials)


def sequence_loss_ref(flow_preds, flows, valids, *, gamma, max_flow):
    """Line-for-line JAX port of the PyTorch forward (for verification)."""
    flow_gt = flows[:, 0]
    valid = valids[:, 0]
    n_predictions = len(flow_preds)
    flow_loss = 0.0
    mag = jnp.sqrt(jnp.sum(flow_gt ** 2, axis=1, keepdims=True))
    valid = (valid >= 0.5) & (mag < max_flow)
    for i in range(n_predictions):
        i_weight = gamma ** (n_predictions - i - 1)
        i_loss = jnp.abs(flow_preds[i] - flow_gt)
        flow_loss = flow_loss + i_weight * jnp.mean(valid[:, None] * i_loss)
    return flow_loss


if __name__ == "__main__":
    # Hyperparameters from the module's __init__ (no learnable weights).
    gamma = 0.9
    max_flow = 400.0

    # Small deterministic shapes: B=2, N_frames=1, 2 flow channels, 32x128
    # spatial, 3 flow predictions in the sequence.
    B, H, W = 2, 32, 128
    n_preds = 3

    key = jax.random.PRNGKey(0)
    k_gt, k_valid, *k_preds = jax.random.split(key, 2 + n_preds)

    # flows: [B, 1, 2, H, W]; scale so some magnitudes exceed max_flow.
    flows = 300.0 * jax.random.normal(k_gt, (B, 1, 2, H, W), dtype=jnp.float32)
    # valids: [B, 1, 1, H, W] in {0, 1}.
    valids = (jax.random.uniform(k_valid, (B, 1, 1, H, W)) > 0.2).astype(jnp.float32)
    # flow predictions: list of [B, 2, H, W].
    flow_preds = [
        flows[:, 0] + 50.0 * jax.random.normal(k, (B, 2, H, W), dtype=jnp.float32)
        for k in k_preds
    ]

    ref = jax.block_until_ready(
        sequence_loss_ref(flow_preds, flows, valids, gamma=gamma, max_flow=max_flow))

    # 1) auto tile size (single tile at this small H).
    loss_auto = jax.block_until_ready(
        sequence_loss(flow_preds, flows, valids, gamma=gamma, max_flow=max_flow))
    assert jnp.allclose(loss_auto, ref, rtol=1e-4, atol=1e-4), (loss_auto, ref)

    # 2) forced small tile (tile_h=8 -> 4 grid steps) to exercise the H-tiled
    #    grid and the per-tile partial accumulation path.
    loss_tiled = jax.block_until_ready(
        sequence_loss(flow_preds, flows, valids, gamma=gamma, max_flow=max_flow,
                      tile_h=8))
    assert jnp.allclose(loss_tiled, ref, rtol=1e-4, atol=1e-4), (loss_tiled, ref)

    print("KERNEL_OK")
</pallas_src>

<mosaic_0001>
module attributes {stable_mosaic.version = 11 : i64} {
  func.func @_sequence_loss_kernel(%arg0: i32, %arg1: memref<2x2x32x128xf32, #tpu.memory_space<vmem>>, %arg2: memref<2x1x32x128xf32, #tpu.memory_space<vmem>>, %arg3: memref<2x2x32x128xf32, #tpu.memory_space<vmem>>, %arg4: memref<2x2x32x128xf32, #tpu.memory_space<vmem>>, %arg5: memref<2x2x32x128xf32, #tpu.memory_space<vmem>>, %arg6: memref<1x1x1xf32, #tpu.memory_space<vmem>>) attributes {dimension_semantics = [#tpu.dimension_semantics<parallel>], iteration_bounds = array<i64: 1>, scalar_prefetch = 0 : i64, scratch_operands = 0 : i64, tpu.core_type = #tpu.core_type<tc>, window_params = [{transform_indices = @transform_0, window_bounds = array<i64: 2, 2, 32, 128>}, {transform_indices = @transform_1, window_bounds = array<i64: 2, 1, 32, 128>}, {transform_indices = @transform_2, window_bounds = array<i64: 2, 2, 32, 128>}, {transform_indices = @transform_3, window_bounds = array<i64: 2, 2, 32, 128>}, {transform_indices = @transform_4, window_bounds = array<i64: 2, 2, 32, 128>}, {transform_indices = @transform_5, window_bounds = array<i64: 1, 1, 1>}]} {
    %c0 = arith.constant 0 : index
    %c0_0 = arith.constant 0 : index
    %c0_1 = arith.constant 0 : index
    %c0_2 = arith.constant 0 : index
    %0 = vector.load %arg1[%c0, %c0_0, %c0_1, %c0_2] : memref<2x2x32x128xf32, #tpu.memory_space<vmem>>, vector<2x2x32x128xf32>
    %1 = arith.mulf %0, %0 : vector<2x2x32x128xf32>
    %cst = arith.constant dense<0.000000e+00> : vector<2x32x128xf32>
    %2 = vector.multi_reduction <add>, %1, %cst [1] : vector<2x2x32x128xf32> to vector<2x32x128xf32>
    %3 = vector.shape_cast %2 : vector<2x32x128xf32> to vector<2x1x32x128xf32>
    %c0_3 = arith.constant 0 : index
    %c0_4 = arith.constant 0 : index
    %c0_5 = arith.constant 0 : index
    %c0_6 = arith.constant 0 : index
    %4 = vector.load %arg2[%c0_3, %c0_4, %c0_5, %c0_6] : memref<2x1x32x128xf32, #tpu.memory_space<vmem>>, vector<2x1x32x128xf32>
    %cst_7 = arith.constant 5.000000e-01 : f32
    %5 = vector.broadcast %cst_7 : f32 to vector<2x1x32x128xf32>
    %6 = arith.cmpf oge, %4, %5 : vector<2x1x32x128xf32>
    %cst_8 = arith.constant 4.000000e+02 : f32
    %cst_9 = arith.constant 4.000000e+02 : f32
    %7 = arith.mulf %cst_8, %cst_9 : f32
    %8 = vector.broadcast %7 : f32 to vector<2x1x32x128xf32>
    %9 = arith.cmpf olt, %3, %8 : vector<2x1x32x128xf32>
    %10 = arith.andi %6, %9 : vector<2x1x32x128xi1>
    %11 = arith.extui %10 : vector<2x1x32x128xi1> to vector<2x1x32x128xi32>
    %12 = arith.sitofp %11 : vector<2x1x32x128xi32> to vector<2x1x32x128xf32>
    %cst_10 = arith.constant dense<0.000000e+00> : vector<32x128xf32>
    %13 = vector.multi_reduction <add>, %12, %cst_10 [0, 1] : vector<2x1x32x128xf32> to vector<32x128xf32>
    %cst_11 = arith.constant 0.000000e+00 : f32
    %14 = vector.broadcast %cst_11 : f32 to vector<32x128xf32>
    %c0_12 = arith.constant 0 : index
    %c0_13 = arith.constant 0 : index
    %c0_14 = arith.constant 0 : index
    %c0_15 = arith.constant 0 : index
    %15 = vector.load %arg3[%c0_12, %c0_13, %c0_14, %c0_15] : memref<2x2x32x128xf32, #tpu.memory_space<vmem>>, vector<2x2x32x128xf32>
    %16 = arith.subf %15, %0 : vector<2x2x32x128xf32>
    %17 = math.absf %16 : vector<2x2x32x128xf32>
    %cst_16 = arith.constant dense<0.000000e+00> : vector<32x128xf32>
    %18 = vector.multi_reduction <add>, %17, %cst_16 [0, 1] : vector<2x2x32x128xf32> to vector<32x128xf32>
    %cst_17 = arith.constant 8.100000e-01 : f32
    %19 = vector.broadcast %cst_17 : f32 to vector<32x128xf32>
    %20 = arith.mulf %19, %18 : vector<32x128xf32>
    %21 = arith.addf %14, %20 : vector<32x128xf32>
    %c0_18 = arith.constant 0 : index
    %c0_19 = arith.constant 0 : index
    %c0_20 = arith.constant 0 : index
    %c0_21 = arith.constant 0 : index
    %22 = vector.load %arg4[%c0_18, %c0_19, %c0_20, %c0_21] : memref<2x2x32x128xf32, #tpu.memory_space<vmem>>, vector<2x2x32x128xf32>
    %23 = arith.subf %22, %0 : vector<2x2x32x128xf32>
    %24 = math.absf %23 : vector<2x2x32x128xf32>
    %cst_22 = arith.constant dense<0.000000e+00> : vector<32x128xf32>
    %25 = vector.multi_reduction <add>, %24, %cst_22 [0, 1] : vector<2x2x32x128xf32> to vector<32x128xf32>
    %cst_23 = arith.constant 0.899999976 : f32
    %26 = vector.broadcast %cst_23 : f32 to vector<32x128xf32>
    %27 = arith.mulf %26, %25 : vector<32x128xf32>
    %28 = arith.addf %21, %27 : vector<32x128xf32>
    %c0_24 = arith.constant 0 : index
    %c0_25 = arith.constant 0 : index
    %c0_26 = arith.constant 0 : index
    %c0_27 = arith.constant 0 : index
    %29 = vector.load %arg5[%c0_24, %c0_25, %c0_26, %c0_27] : memref<2x2x32x128xf32, #tpu.memory_space<vmem>>, vector<2x2x32x128xf32>
    %30 = arith.subf %29, %0 : vector<2x2x32x128xf32>
    %31 = math.absf %30 : vector<2x2x32x128xf32>
    %cst_28 = arith.constant dense<0.000000e+00> : vector<32x128xf32>
    %32 = vector.multi_reduction <add>, %31, %cst_28 [0, 1] : vector<2x2x32x128xf32> to vector<32x128xf32>
    %cst_29 = arith.constant 1.000000e+00 : f32
    %33 = vector.broadcast %cst_29 : f32 to vector<32x128xf32>
    %34 = arith.mulf %33, %32 : vector<32x128xf32>
    %35 = arith.addf %28, %34 : vector<32x128xf32>
    %36 = arith.mulf %13, %35 : vector<32x128xf32>
    %37 = vector.shape_cast %36 : vector<32x128xf32> to vector<1x32x128xf32>
    %cst_30 = arith.constant dense<0.000000e+00> : vector<1xf32>
    %38 = vector.multi_reduction <add>, %37, %cst_30 [1, 2] : vector<1x32x128xf32> to vector<1xf32>
    %39 = vector.shape_cast %38 : vector<1xf32> to vector<1x1x1xf32>
    %40 = vector.extract %39[0, 0, 0] : f32 from vector<1x1x1xf32>
    %cst_31 = arith.constant 3.05175781E-5 : f32
    %41 = arith.mulf %40, %cst_31 : f32
    %42 = vector.broadcast %41 : f32 to vector<1x1x1xf32>
    %c0_32 = arith.constant 0 : index
    %c0_33 = arith.constant 0 : index
    %c0_34 = arith.constant 0 : index
    %43 = vector.load %arg6[%c0_32, %c0_33, %c0_34] : memref<1x1x1xf32, #tpu.memory_space<vmem>>, vector<1x1x1xf32>
    tpu.vector_store %arg6[%c0_32, %c0_33, %c0_34], %42 {strides = array<i32>} : memref<1x1x1xf32, #tpu.memory_space<vmem>>, vector<1x1x1xf32>,
    return
  }
  func.func @transform_0(%arg0: i32) -> (i32, i32, i32, i32) {
    %c0_i32 = arith.constant 0 : i32
    %c0_i32_0 = arith.constant 0 : i32
    %c0_i32_1 = arith.constant 0 : i32
    %c0_i32_2 = arith.constant 0 : i32
    return %c0_i32, %c0_i32_0, %arg0, %c0_i32_1 : i32, i32, i32, i32
  }
  func.func @transform_1(%arg0: i32) -> (i32, i32, i32, i32) {
    %c0_i32 = arith.constant 0 : i32
    %c0_i32_0 = arith.constant 0 : i32
    %c0_i32_1 = arith.constant 0 : i32
    %c0_i32_2 = arith.constant 0 : i32
    return %c0_i32, %c0_i32_0, %arg0, %c0_i32_1 : i32, i32, i32, i32
  }
  func.func @transform_2(%arg0: i32) -> (i32, i32, i32, i32) {
    %c0_i32 = arith.constant 0 : i32
    %c0_i32_0 = arith.constant 0 : i32
    %c0_i32_1 = arith.constant 0 : i32
    %c0_i32_2 = arith.constant 0 : i32
    return %c0_i32, %c0_i32_0, %arg0, %c0_i32_1 : i32, i32, i32, i32
  }
  func.func @transform_3(%arg0: i32) -> (i32, i32, i32, i32) {
    %c0_i32 = arith.constant 0 : i32
    %c0_i32_0 = arith.constant 0 : i32
    %c0_i32_1 = arith.constant 0 : i32
    %c0_i32_2 = arith.constant 0 : i32
    return %c0_i32, %c0_i32_0, %arg0, %c0_i32_1 : i32, i32, i32, i32
  }
  func.func @transform_4(%arg0: i32) -> (i32, i32, i32, i32) {
    %c0_i32 = arith.constant 0 : i32
    %c0_i32_0 = arith.constant 0 : i32
    %c0_i32_1 = arith.constant 0 : i32
    %c0_i32_2 = arith.constant 0 : i32
    return %c0_i32, %c0_i32_0, %arg0, %c0_i32_1 : i32, i32, i32, i32
  }
  func.func @transform_5(%arg0: i32) -> (i32, i32, i32) {
    %c0_i32 = arith.constant 0 : i32
    %c0_i32_0 = arith.constant 0 : i32
    %c0_i32_1 = arith.constant 0 : i32
    return %arg0, %c0_i32, %c0_i32_0 : i32, i32, i32
  }
}

</mosaic_0001>

<bundles_post_ra>
// kernel: tpu_custom_call.1
= control target key start
LH: loop header
LB: loop body
LE: loop exit
PB: predicated region body
PF: predicated region fallthrough
CT: control target
= control target key end

     0   :  { %10 = vsyncpa [#allocation3], 0  ;;  %s936_s0 = inlined_call_operand.hbm [shape: f32[2,2,32,128], index: 0, kind: input, shape index: {}]   ;;  %s937_s1 = inlined_call_operand.hbm [shape: f32[2,1,32,128], index: 1, kind: input, shape index: {}]   ;;  %s938_s2 = inlined_call_operand.hbm [shape: f32[2,2,32,128], index: 2, kind: input, shape index: {}]   ;;  %s939_s3 = inlined_call_operand.hbm [shape: f32[2,2,32,128], index: 3, kind: input, shape index: {}]   ;;  %s940_s4 = inlined_call_operand.hbm [shape: f32[2,2,32,128], index: 4, kind: input, shape index: {}]   ;;  %s941_s5 = inlined_call_operand.hbm [shape: f32[1,1,1], index: 5, kind: output, shape index: {}]  }
   0x1   :  { %11 = vsyncpa [#allocation6], 0 }
   0x2   :  { %12 = vsyncpa [#allocation9], 0 }
   0x3   :  { %13 = vsyncpa [#allocation4], 0  ;;  %s577_s18 = smov [#allocation5]   ;;  %s578_s20 = smov [#allocation8]  }
   0x4   :  { %s31_s19 = sshll.u32 %s577_s18, 4  ;;  %s55_s21 = sshll.u32 %s578_s20, 4  ;;  %s32_s19 = int_to_ptr.vmem [resolvable:$true] %s31_s19  ;;  %s616_s21 = int_to_ptr.vmem [resolvable:$true] %s55_s21 }
   0x5   :  { %s437_s24 = scalar_lea.hbm %s937_s1, 1024 }
   0x6   :  { %p438_p0 = scmp.ne.s32.totalorder %s937_s1, %s437_s24  ;;  %p441_p1 = scmp.lt.u32.totalorder %s437_s24, %s937_s1 }
   0x8   :  { %p443_p2 = pnand %p441_p1, %p438_p0 }
   0xa   :  { %446 = shalt.err (!%p443_p2)
}
   0xb   :  { %s447_s29 = scalar_lea.vmem %s32_s19, 1024  ;;  %p452_p4 = scmp.lt.s32.totalorder %s32_s19, %s32_s19 }
   0xc   :  { %p448_p3 = scmp.ne.s32.totalorder %s32_s19, %s447_s29  ;;  %p453_p5 = scmp.lt.s32.totalorder %s447_s29, %s447_s29 }
   0xe   :  { %p454_p6 = por %p453_p5, %p452_p4 }
  0x10   :  { %p455_p7 = pnand %p454_p6, %p448_p3 }
  0x12   :  { %458 = shalt.err (!%p455_p7)
}
  0x13   :  { %s579_s30 = smov 128   ;;  %s580_s6 = smov 8  }
  0x14   :  { %37 = dma.hbm_to_vmem [thread:$0]  %s937_s1, 1024, %s32_s19, [#allocation6], %s579_s30, %s579_s30, %s580_s6  }
  0x15   :  { %s459_s11 = scalar_lea.hbm %s939_s3, 2048 }
  0x16   :  { %p460_p8 = scmp.ne.s32.totalorder %s939_s3, %s459_s11  ;;  %p463_p9 = scmp.lt.u32.totalorder %s459_s11, %s939_s3 }
  0x18   :  { %p465_p10 = pnand %p463_p9, %p460_p8 }
  0x1a   :  { %468 = shalt.err (!%p465_p10)
}
  0x1b   :  { %s469_s16 = scalar_lea.vmem %s616_s21, 2048  ;;  %p474_p12 = scmp.lt.s32.totalorder %s616_s21, %s616_s21 }
  0x1c   :  { %p470_p11 = scmp.ne.s32.totalorder %s616_s21, %s469_s16  ;;  %p475_p13 = scmp.lt.s32.totalorder %s469_s16, %s469_s16 }
  0x1e   :  { %p476_p0 = por %p475_p13, %p474_p12 }
  0x20   :  { %p477_p1 = pnand %p476_p0, %p470_p11 }
  0x22   :  { %480 = shalt.err (!%p477_p1)
}
  0x23   :  { %61 = dma.hbm_to_vmem [thread:$0]  %s939_s3, 2048, %s616_s21, [#allocation9], %s579_s30, %s579_s30, %s580_s6  }
  0x24   :  { %s581_s18 = smov [#allocation2]   ;;  %s582_s20 = smov [#allocation7]  }
  0x25   :  { %s19_s19 = sshll.u32 %s581_s18, 4  ;;  %s43_s22 = sshll.u32 %s582_s20, 4  ;;  %s20_s19 = int_to_ptr.vmem [resolvable:$true] %s19_s19  ;;  %s653_s22 = int_to_ptr.vmem [resolvable:$true] %s43_s22 }
  0x26   :  { %s481_s25 = scalar_lea.hbm %s936_s0, 2048 }
  0x27   :  { %p482_p2 = scmp.ne.s32.totalorder %s936_s0, %s481_s25  ;;  %p485_p3 = scmp.lt.u32.totalorder %s481_s25, %s936_s0 }
  0x29   :  { %p487_p4 = pnand %p485_p3, %p482_p2 }
  0x2b   :  { %490 = shalt.err (!%p487_p4)
}
  0x2c   :  { %s491_s3 = scalar_lea.vmem %s20_s19, 2048  ;;  %p496_p6 = scmp.lt.s32.totalorder %s20_s19, %s20_s19 }
  0x2d   :  { %p492_p5 = scmp.ne.s32.totalorder %s20_s19, %s491_s3  ;;  %p497_p7 = scmp.lt.s32.totalorder %s491_s3, %s491_s3 }
  0x2f   :  { %p498_p8 = por %p497_p7, %p496_p6 }
  0x31   :  { %p499_p9 = pnand %p498_p8, %p492_p5 }
  0x33   :  { %502 = shalt.err (!%p499_p9)
}
  0x34   :  { %25 = dma.hbm_to_vmem [thread:$0]  %s936_s0, 2048, %s20_s19, [#allocation3], %s579_s30, %s579_s30, %s580_s6  }
  0x35   :  { %s503_s10 = scalar_lea.hbm %s938_s2, 2048 }
  0x36   :  { %p504_p10 = scmp.ne.s32.totalorder %s938_s2, %s503_s10  ;;  %p507_p11 = scmp.lt.u32.totalorder %s503_s10, %s938_s2 }
  0x38   :  { %p509_p12 = pnand %p507_p11, %p504_p10 }
  0x3a   :  { %512 = shalt.err (!%p509_p12)
}
  0x3b   :  { %s513_s15 = scalar_lea.vmem %s653_s22, 2048  ;;  %p518_p0 = scmp.lt.s32.totalorder %s653_s22, %s653_s22 }
  0x3c   :  { %p514_p13 = scmp.ne.s32.totalorder %s653_s22, %s513_s15  ;;  %p519_p1 = scmp.lt.s32.totalorder %s513_s15, %s513_s15 }
  0x3e   :  { %p520_p2 = por %p519_p1, %p518_p0 }
  0x40   :  { %p521_p3 = pnand %p520_p2, %p514_p13 }
  0x42   :  { %524 = shalt.err (!%p521_p3)
}
  0x43   :  { %49 = dma.hbm_to_vmem [thread:$0]  %s938_s2, 2048, %s653_s22, [#allocation6], %s579_s30, %s579_s30, %s580_s6  }
  0x44   :  { %s583_s1 = smov [#allocation10]   ;;  %s525_s20 = scalar_lea.hbm %s940_s4, 2048 }
  0x45   :  { %s67_s17 = sshll.u32 %s583_s1, 4  ;;  %p526_p4 = scmp.ne.s32.totalorder %s940_s4, %s525_s20  ;;  %s68_s17 = int_to_ptr.vmem [resolvable:$true] %s67_s17 }
  0x46   :  { %p529_p5 = scmp.lt.u32.totalorder %s525_s20, %s940_s4 }
  0x48   :  { %p531_p6 = pnand %p529_p5, %p526_p4 }
  0x4a   :  { %534 = shalt.err (!%p531_p6)
}
  0x4b   :  { %s535_s27 = scalar_lea.vmem %s68_s17, 2048  ;;  %p540_p8 = scmp.lt.s32.totalorder %s68_s17, %s68_s17 }
  0x4c   :  { %p536_p7 = scmp.ne.s32.totalorder %s68_s17, %s535_s27  ;;  %p541_p9 = scmp.lt.s32.totalorder %s535_s27, %s535_s27 }
  0x4e   :  { %p542_p10 = por %p541_p9, %p540_p8 }
  0x50   :  { %p543_p11 = pnand %p542_p10, %p536_p7 }
  0x52   :  { %546 = shalt.err (!%p543_p11)
}
  0x53   :  { %73 = dma.hbm_to_vmem [thread:$0]  %s940_s4, 2048, %s68_s17, [#allocation9], %s579_s30, %s579_s30, %s580_s6  }
  0x54   :  { %569 = dma.done.wait [#allocation3], 2048  }
  0x55   :  { %570 = vsyncadd [#allocation3], 4294965248 }
  0x56   :  { %571 = dma.done.wait [#allocation6], 3072  }
  0x57   :  { %572 = vsyncadd [#allocation6], 4294964224 }
  0x58   :  { %573 = dma.done.wait [#allocation9], 4096  }
  0x59   :  { %574 = vsyncadd [#allocation9], 4294963200  ;;  %v705_v0 = vld [vmem:[#allocation2] sm:$0xff]  ;;  %v707_v1 = vld [vmem:[#allocation2 + $0x8] sm:$0xff]  ;;  %v942_v61 = vmov 0.0   ;;  %s585_s4 = smov [#allocation11]  }
  0x5a   :  { %v709_v2 = vld [vmem:[#allocation2 + $0x10] sm:$0xff]  ;;  %v711_v3 = vld [vmem:[#allocation2 + $0x18] sm:$0xff]  ;;  %v713_v4 = vld [vmem:[#allocation2 + $0x20] sm:$0xff]  ;;  %v105_v6 = vmul.f32 %v705_v0, %v705_v0  ;;  %v106_v7 = vmul.f32 %v707_v1, %v707_v1  ;;  %s407_s30 = sshll.u32 %s585_s4, 4  ;;  %s408_s30 = int_to_ptr.vmem [resolvable:$true] %s407_s30 }
  0x5b   :  { %v715_v5 = vld [vmem:[#allocation2 + $0x28] sm:$0xff]  ;;  %v721_v8 = vld [vmem:[#allocation2 + $0x30] sm:$0xff]  ;;  %v723_v9 = vld [vmem:[#allocation2 + $0x38] sm:$0xff]  ;;  %v107_v11 = vmul.f32 %v709_v2, %v709_v2  ;;  %v108_v12 = vmul.f32 %v711_v3, %v711_v3  ;;  %v109_v13 = vmul.f32 %v713_v4, %v713_v4  ;;  %s547_s29 = scalar_lea.vmem %s408_s30, 16  ;;  %s551_s3 = scalar_lea.vmem %s408_s30, 32 }
  0x5c   :  { %v725_v10 = vld [vmem:[#allocation2 + $0x40] sm:$0xff]  ;;  %v110_v14 = vmul.f32 %v715_v5, %v715_v5  ;;  %v735_v15 = vld [vmem:[#allocation2 + $0x48] sm:$0xff]  ;;  %v737_v16 = vld [vmem:[#allocation2 + $0x50] sm:$0xff]  ;;  %v111_v17 = vmul.f32 %v721_v8, %v721_v8  ;;  %v112_v18 = vmul.f32 %v723_v9, %v723_v9  ;;  %p548_p12 = scmp.ne.s32.totalorder %s408_s30, %s547_s29  ;;  %p552_p13 = scmp.lt.s32.totalorder %s408_s30, %s408_s30 }
  0x5d   :  { %v113_v19 = vmul.f32 %v725_v10, %v725_v10  ;;  %v745_v20 = vld [vmem:[#allocation2 + $0x60] sm:$0xff]  ;;  %v747_v21 = vld [vmem:[#allocation2 + $0x68] sm:$0xff]  ;;  %v749_v22 = vld [vmem:[#allocation2 + $0x70] sm:$0xff]  ;;  %v114_v23 = vmul.f32 %v735_v15, %v735_v15  ;;  %v115_v24 = vmul.f32 %v737_v16, %v737_v16  ;;  %v121_v28 = vadd.f32 %v109_v13, %v105_v6  ;;  %p553_p0 = scmp.lt.s32.totalorder %s551_s3, %s547_s29 }
  0x5e   :  { %v117_v25 = vmul.f32 %v745_v20, %v745_v20  ;;  %v118_v26 = vmul.f32 %v747_v21, %v747_v21  ;;  %v119_v27 = vmul.f32 %v749_v22, %v749_v22  ;;  %v129_v29 = vld [vmem:[#allocation5] sm:$0xff]  ;;  %v130_v30 = vld [vmem:[#allocation5 + $0x8] sm:$0xff]  ;;  %v122_v31 = vadd.f32 %v110_v14, %v106_v7  ;;  %v131_v34 = vld [vmem:[#allocation5 + $0x10] sm:$0xff] }
  0x5f   :  { %v123_v32 = vadd.f32 %v111_v17, %v107_v11  ;;  %v124_v33 = vadd.f32 %v112_v18, %v108_v12  ;;  %v761_v35 = vld [vmem:[#allocation2 + $0x58] sm:$0xff]  ;;  %vm137_vm0 = vcmp.ge.f32.partialorder %v129_v29, 0.5  ;;  %v133_v41 = vld [vmem:[#allocation5 + $0x20] sm:$0xff]  ;;  %vm138_vm1 = vcmp.ge.f32.partialorder %v130_v30, 0.5  ;;  %v134_v44 = vld [vmem:[#allocation5 + $0x28] sm:$0xff]  ;;  %p554_p1 = por %p553_p0, %p552_p13 }
  0x60   :  { %v763_v36 = vld [vmem:[#allocation2 + $0x78] sm:$0xff]  ;;  %v125_v37 = vadd.f32 %v117_v25, %v113_v19  ;;  %v116_v39 = vmul.f32 %v761_v35, %v761_v35  ;;  %v769_v42 = vadd.f32 %v118_v26, %v114_v23  ;;  %v771_v43 = vadd.f32 %v119_v27, %v115_v24  ;;  %v773_v45 = vld [vmem:[#allocation5 + $0x30] sm:$0xff]  ;;  %v181_v46 = vld [vmem:[#allocation7] sm:$0xff] }
  0x61   :  { %v132_v38 = vld [vmem:[#allocation5 + $0x18] sm:$0xff]  ;;  %v120_v40 = vmul.f32 %v763_v36, %v763_v36  ;;  %vm139_vm2 = vcmp.ge.f32.partialorder %v131_v34, 0.5  ;;  %vm145_vm3 = vcmp.lt.f32.partialorder %v121_v28, 160000.0  ;;  %vm146_vm5 = vcmp.lt.f32.partialorder %v122_v31, 160000.0  ;;  %v182_v48 = vld [vmem:[#allocation7 + $0x8] sm:$0xff]  ;;  %v183_v49 = vld [vmem:[#allocation7 + $0x10] sm:$0xff]  ;;  %p555_p2 = pnand %p554_p1, %p548_p12 }
  0x62   :  { %vm140_vm4 = vcmp.ge.f32.partialorder %v132_v38, 0.5  ;;  %vm147_vm6 = vcmp.lt.f32.partialorder %v123_v32, 160000.0  ;;  %vm148_vm7 = vcmp.lt.f32.partialorder %v124_v33, 160000.0  ;;  %vm776_vm8 = vmand %vm137_vm0, %vm145_vm3  ;;  %vm141_vm9 = vcmp.ge.f32.partialorder %v133_v41, 0.5  ;;  %v184_v51 = vld [vmem:[#allocation7 + $0x18] sm:$0xff]  ;;  %v185_v52 = vld [vmem:[#allocation7 + $0x20] sm:$0xff] }
  0x63   :  { %vm149_vm10 = vcmp.lt.f32.partialorder %v125_v37, 160000.0  ;;  %vm781_vm11 = vmand %vm138_vm1, %vm146_vm5  ;;  %v785_v53 = vadd.f32 %v120_v40, %v116_v39  ;;  %v186_v55 = vld [vmem:[#allocation7 + $0x28] sm:$0xff]  ;;  %v187_v56 = vld [vmem:[#allocation7 + $0x30] sm:$0xff]  ;;  %vm142_vm13 = vcmp.ge.f32.partialorder %v134_v44, 0.5  ;;  %vm143_vm14 = vcmp.ge.f32.partialorder %v773_v45, 0.5 }
  0x64   :  { %vm788_vm12 = vmand %vm139_vm2, %vm147_vm6  ;;  %vm150_vm15 = vcmp.lt.f32.partialorder %v769_v42, 160000.0  ;;  %vm151_vm0 = vcmp.lt.f32.partialorder %v771_v43, 160000.0  ;;  %v188_v58 = vld [vmem:[#allocation7 + $0x38] sm:$0xff]  ;;  %v189_v59 = vld [vmem:[#allocation7 + $0x40] sm:$0xff]  ;;  %v418_v62 = vsel %vm776_vm8, 1.0, %v942_v61  ;;  %v813_v63 = vsel %vm781_vm11, 1.0, %v942_v61 }
  0x65   :  { %vm797_vm1 = vmand %vm140_vm4, %vm148_vm7  ;;  %v190_v6 = vld [vmem:[#allocation7 + $0x48] sm:$0xff]  ;;  %v191_v7 = vld [vmem:[#allocation7 + $0x50] sm:$0xff]  ;;  %v197_v11 = vsub.f32 %v181_v46, %v705_v0  ;;  %v198_v12 = vsub.f32 %v182_v48, %v707_v1  ;;  %v820_v13 = vsel %vm788_vm12, 1.0, %v942_v61  ;;  %v199_v18 = vsub.f32 %v183_v49, %v709_v2 }
  0x66   :  { %vm803_vm2 = vmand %vm141_vm9, %vm149_vm10  ;;  %v193_v14 = vld [vmem:[#allocation7 + $0x60] sm:$0xff]  ;;  %v194_v17 = vld [vmem:[#allocation7 + $0x68] sm:$0xff]  ;;  %v200_v19 = vsub.f32 %v184_v51, %v711_v3  ;;  %v201_v23 = vsub.f32 %v185_v52, %v713_v4  ;;  %v828_v24 = vsel %vm797_vm1, 1.0, %v942_v61  ;;  %v202_v26 = vsub.f32 %v186_v55, %v715_v5 }
  0x67   :  { %v192_v25 = vld [vmem:[#allocation7 + $0x58] sm:$0xff]  ;;  %v203_v27 = vsub.f32 %v187_v56, %v721_v8  ;;  %v204_v28 = vsub.f32 %v188_v58, %v723_v9  ;;  %v422_v29 = vsel %vm803_vm2, 1.0, %v942_v61  ;;  %v195_v30 = vld [vmem:[#allocation7 + $0x70] sm:$0xff]  ;;  %v205_v31 = vsub.f32 %v189_v59, %v725_v10  ;;  %vm158_vm3 = vmand %vm142_vm13, %vm150_vm15 }
  0x68   :  { %v206_v32 = vsub.f32 %v190_v6, %v735_v15  ;;  %v207_v33 = vsub.f32 %v191_v7, %v737_v16  ;;  %v196_v34 = vld [vmem:[#allocation7 + $0x78] sm:$0xff]  ;;  %v209_v37 = vsub.f32 %v193_v14, %v745_v20  ;;  %v210_v38 = vsub.f32 %v194_v17, %v747_v21  ;;  %vm850_vm4 = vmand %vm143_vm14, %vm151_vm0  ;;  %v249_v6 = vld [vmem:[#allocation8] sm:$0xff] }
  0x69   :  { %v213_v39 = vand.u32 2147483647, %v197_v11  ;;  %v214_v40 = vand.u32 2147483647, %v198_v12  ;;  %v208_v41 = vsub.f32 %v192_v25, %v761_v35  ;;  %v215_v46 = vand.u32 2147483647, %v199_v18 }
  0x6a   :  { %v216_v47 = vand.u32 2147483647, %v200_v19  ;;  %v217_v48 = vand.u32 2147483647, %v201_v23  ;;  %v211_v49 = vsub.f32 %v195_v30, %v749_v22  ;;  %v218_v50 = vand.u32 2147483647, %v202_v26 }
  0x6b   :  { %v219_v51 = vand.u32 2147483647, %v203_v27  ;;  %v220_v52 = vand.u32 2147483647, %v204_v28  ;;  %v221_v54 = vand.u32 2147483647, %v205_v31  ;;  %v212_v42 = vsub.f32 %v196_v34, %v763_v36 }
  0x6c   :  { %v222_v55 = vand.u32 2147483647, %v206_v32  ;;  %v223_v56 = vand.u32 2147483647, %v207_v33  ;;  %v229_v57 = vadd.f32 %v217_v48, %v213_v39  ;;  %v225_v44 = vand.u32 2147483647, %v209_v37 }
  0x6d   :  { %v226_v59 = vand.u32 2147483647, %v210_v38  ;;  %v232_v60 = vadd.f32 %v218_v50, %v214_v40  ;;  %v856_v7 = vsel %vm158_vm3, 1.0, %v942_v61  ;;  %v224_v11 = vand.u32 2147483647, %v208_v41  ;;  %v250_v17 = vld [vmem:[#allocation8 + $0x8] sm:$0xff] }
  0x6e   :  { %v230_v12 = vadd.f32 %v229_v57, %v221_v54  ;;  %v235_v14 = vadd.f32 %v219_v51, %v215_v46  ;;  %v251_v43 = vld [vmem:[#allocation8 + $0x10] sm:$0xff]  ;;  %v858_v18 = vadd.f32 %v422_v29, %v418_v62  ;;  %v227_v45 = vand.u32 2147483647, %v211_v49  ;;  %v252_v25 = vld [vmem:[#allocation8 + $0x18] sm:$0xff]  ;;  %v253_v26 = vld [vmem:[#allocation8 + $0x20] sm:$0xff] }
  0x6f   :  { %v233_v19 = vadd.f32 %v232_v60, %v222_v55  ;;  %v238_v23 = vadd.f32 %v220_v52, %v216_v47  ;;  %v254_v27 = vld [vmem:[#allocation8 + $0x28] sm:$0xff]  ;;  %v863_v28 = vsel %vm850_vm4, 1.0, %v942_v61  ;;  %v255_v32 = vld [vmem:[#allocation8 + $0x30] sm:$0xff]  ;;  %v256_v33 = vld [vmem:[#allocation8 + $0x38] sm:$0xff]  ;;  %v265_v34 = vsub.f32 %v249_v6, %v705_v0 }
  0x70   :  { %v231_v30 = vadd.f32 %v230_v12, %v225_v44  ;;  %v236_v31 = vadd.f32 %v235_v14, %v223_v56  ;;  %v228_v37 = vand.u32 2147483647, %v212_v42  ;;  %v257_v29 = vld [vmem:[#allocation8 + $0x40] sm:$0xff]  ;;  %v258_v38 = vld [vmem:[#allocation8 + $0x48] sm:$0xff]  ;;  %v259_v39 = vld [vmem:[#allocation8 + $0x50] sm:$0xff]  ;;  %v266_v40 = vsub.f32 %v250_v17, %v707_v1 }
  0x71   :  { %v234_v62 = vadd.f32 %v233_v19, %v226_v59  ;;  %v267_v41 = vsub.f32 %v251_v43, %v709_v2  ;;  %v239_v46 = vadd.f32 %v238_v23, %v224_v11  ;;  %v260_v47 = vld [vmem:[#allocation8 + $0x58] sm:$0xff]  ;;  %v261_v48 = vld [vmem:[#allocation8 + $0x60] sm:$0xff]  ;;  %v262_v49 = vld [vmem:[#allocation8 + $0x68] sm:$0xff]  ;;  %v268_v50 = vsub.f32 %v252_v25, %v711_v3 }
  0x72   :  { %v269_v51 = vsub.f32 %v253_v26, %v713_v4  ;;  %v270_v52 = vsub.f32 %v254_v27, %v715_v5  ;;  %v237_v54 = vadd.f32 %v236_v31, %v227_v45  ;;  %v871_v55 = vmul.f32 0.81, %v231_v30  ;;  %v263_v56 = vld [vmem:[#allocation8 + $0x70] sm:$0xff]  ;;  %v264_v44 = vld [vmem:[#allocation8 + $0x78] sm:$0xff] }
  0x73   :  { %v271_v57 = vsub.f32 %v255_v32, %v721_v8  ;;  %v272_v58 = vsub.f32 %v256_v33, %v723_v9  ;;  %v875_v42 = vmul.f32 0.81, %v234_v62  ;;  %v273_v59 = vsub.f32 %v257_v29, %v725_v10  ;;  %v883_v43 = vld [vmem:[#allocation5 + $0x38] sm:$0xff]  ;;  %v317_v32 = vld [vmem:[#allocation10] sm:$0xff]  ;;  %v318_v33 = vld [vmem:[#allocation10 + $0x8] sm:$0xff] }
  0x74   :  { %v274_v60 = vsub.f32 %v258_v38, %v735_v15  ;;  %v275_v6 = vsub.f32 %v259_v39, %v737_v16  ;;  %v276_v11 = vsub.f32 %v260_v47, %v761_v35  ;;  %v277_v12 = vsub.f32 %v261_v48, %v745_v20  ;;  %v319_v47 = vld [vmem:[#allocation10 + $0x10] sm:$0xff] }
  0x75   :  { %v278_v14 = vsub.f32 %v262_v49, %v747_v21  ;;  %v281_v17 = vand.u32 2147483647, %v265_v34  ;;  %v279_v45 = vsub.f32 %v263_v56, %v749_v22  ;;  %v282_v19 = vand.u32 2147483647, %v266_v40 }
  0x76   :  { %v283_v23 = vand.u32 2147483647, %v267_v41  ;;  %v284_v25 = vand.u32 2147483647, %v268_v50  ;;  %v280_v26 = vsub.f32 %v264_v44, %v763_v36  ;;  %v285_v27 = vand.u32 2147483647, %v269_v51 }
  0x77   :  { %v286_v30 = vand.u32 2147483647, %v270_v52  ;;  %v287_v31 = vand.u32 2147483647, %v271_v57  ;;  %v240_v62 = vadd.f32 %v239_v46, %v228_v37  ;;  %v288_v29 = vand.u32 2147483647, %v272_v58 }
  0x78   :  { %v289_v38 = vand.u32 2147483647, %v273_v59  ;;  %v290_v39 = vand.u32 2147483647, %v274_v60  ;;  %v291_v34 = vand.u32 2147483647, %v275_v6  ;;  %v297_v61 = vadd.f32 %v285_v27, %v281_v17 }
  0x79   :  { %v292_v48 = vand.u32 2147483647, %v276_v11  ;;  %v293_v49 = vand.u32 2147483647, %v277_v12  ;;  %v887_v56 = vmul.f32 0.81, %v237_v54  ;;  %v300_v50 = vadd.f32 %v286_v30, %v282_v19 }
  0x7a   :  { %v294_v40 = vand.u32 2147483647, %v278_v14  ;;  %v295_v41 = vand.u32 2147483647, %v279_v45  ;;  %vm144_vm5 = vcmp.ge.f32.partialorder %v883_v43, 0.5  ;;  %vm152_vm6 = vcmp.lt.f32.partialorder %v785_v53, 160000.0 }
  0x7b   :  { %v296_v51 = vand.u32 2147483647, %v280_v26  ;;  %v298_v52 = vadd.f32 %v297_v61, %v289_v38  ;;  %v303_v37 = vadd.f32 %v287_v31, %v283_v23  ;;  %v306_v46 = vadd.f32 %v288_v29, %v284_v25  ;;  %v320_v57 = vld [vmem:[#allocation10 + $0x18] sm:$0xff]  ;;  %v321_v58 = vld [vmem:[#allocation10 + $0x20] sm:$0xff]  ;;  %v322_v44 = vld [vmem:[#allocation10 + $0x28] sm:$0xff] }
  0x7c   :  { %v891_v59 = vmul.f32 0.81, %v240_v62  ;;  %v301_v60 = vadd.f32 %v300_v50, %v290_v39  ;;  %v323_v6 = vld [vmem:[#allocation10 + $0x30] sm:$0xff]  ;;  %v324_v54 = vld [vmem:[#allocation10 + $0x38] sm:$0xff]  ;;  %v333_v11 = vsub.f32 %v317_v32, %v705_v0  ;;  %v334_v12 = vsub.f32 %v318_v33, %v707_v1  ;;  %v325_v19 = vld [vmem:[#allocation10 + $0x40] sm:$0xff] }
  0x7d   :  { %v299_v14 = vadd.f32 %v298_v52, %v293_v49  ;;  %v304_v17 = vadd.f32 %v303_v37, %v291_v34  ;;  %v307_v45 = vadd.f32 %v306_v46, %v292_v48  ;;  %v326_v26 = vld [vmem:[#allocation10 + $0x48] sm:$0xff]  ;;  %v327_v61 = vld [vmem:[#allocation10 + $0x50] sm:$0xff]  ;;  %v335_v23 = vsub.f32 %v319_v47, %v709_v2  ;;  %v328_v27 = vld [vmem:[#allocation10 + $0x58] sm:$0xff] }
  0x7e   :  { %v302_v25 = vadd.f32 %v301_v60, %v294_v40  ;;  %v329_v30 = vld [vmem:[#allocation10 + $0x60] sm:$0xff]  ;;  %v336_v31 = vsub.f32 %v320_v57, %v711_v3  ;;  %v337_v62 = vsub.f32 %v321_v58, %v713_v4  ;;  %v338_v29 = vsub.f32 %v322_v44, %v715_v5  ;;  %v330_v1 = vld [vmem:[#allocation10 + $0x68] sm:$0xff]  ;;  %v331_v34 = vld [vmem:[#allocation10 + $0x70] sm:$0xff] }
  0x7f   :  { %v305_v0 = vadd.f32 %v304_v17, %v295_v41  ;;  %v308_v32 = vadd.f32 %v307_v45, %v296_v51  ;;  %v339_v33 = vsub.f32 %v323_v6, %v721_v8  ;;  %v340_v38 = vsub.f32 %v324_v54, %v723_v9  ;;  %v332_v4 = vld [vmem:[#allocation10 + $0x78] sm:$0xff]  ;;  %vm160_vm7 = vmand %vm144_vm5, %vm152_vm6 }
  0x80   :  { %v309_v39 = vmul.f32 0.9, %v299_v14  ;;  %v341_v2 = vsub.f32 %v325_v19, %v725_v10  ;;  %v342_v47 = vsub.f32 %v326_v26, %v735_v15  ;;  %v343_v48 = vsub.f32 %v327_v61, %v737_v16 }
  0x81   :  { %v310_v3 = vmul.f32 0.9, %v302_v25  ;;  %v311_v49 = vmul.f32 0.9, %v305_v0  ;;  %v344_v5 = vsub.f32 %v328_v27, %v761_v35  ;;  %v345_v40 = vsub.f32 %v329_v30, %v745_v20 }
  0x82   :  { %v312_v41 = vmul.f32 0.9, %v308_v32  ;;  %v346_v8 = vsub.f32 %v330_v1, %v747_v21  ;;  %v349_v50 = vand.u32 2147483647, %v333_v11  ;;  %v350_v9 = vand.u32 2147483647, %v334_v12 }
  0x83   :  { %v347_v51 = vsub.f32 %v331_v34, %v749_v22  ;;  %v351_v52 = vand.u32 2147483647, %v335_v23  ;;  %v352_v10 = vand.u32 2147483647, %v336_v31  ;;  %v353_v37 = vand.u32 2147483647, %v337_v62 }
  0x84   :  { %v348_v15 = vsub.f32 %v332_v4, %v763_v36  ;;  %v354_v16 = vand.u32 2147483647, %v338_v29  ;;  %v355_v46 = vand.u32 2147483647, %v339_v33  ;;  %v356_v57 = vand.u32 2147483647, %v340_v38 }
  0x85   :  { %v357_v58 = vand.u32 2147483647, %v341_v2  ;;  %v358_v44 = vand.u32 2147483647, %v342_v47  ;;  %v359_v35 = vand.u32 2147483647, %v343_v48  ;;  %v365_v60 = vadd.f32 %v353_v37, %v349_v50 }
  0x86   :  { %v360_v20 = vand.u32 2147483647, %v344_v5  ;;  %v361_v21 = vand.u32 2147483647, %v345_v40  ;;  %v362_v22 = vand.u32 2147483647, %v346_v8  ;;  %v368_v6 = vadd.f32 %v354_v16, %v350_v9 }
  0x87   :  { %v313_v54 = vadd.f32 %v309_v39, %v871_v55  ;;  %v363_v11 = vand.u32 2147483647, %v347_v51  ;;  %v366_v36 = vadd.f32 %v365_v60, %v357_v58  ;;  %v371_v12 = vadd.f32 %v355_v46, %v351_v52 }
  0x88   :  { %v314_v14 = vadd.f32 %v310_v3, %v875_v42  ;;  %v364_v17 = vand.u32 2147483647, %v348_v15  ;;  %v369_v45 = vadd.f32 %v368_v6, %v358_v44  ;;  %v374_v19 = vadd.f32 %v356_v57, %v352_v10 }
  0x89   :  { %v955_v26 = vmov 0.0   ;;  %v315_v53 = vadd.f32 %v311_v49, %v887_v56  ;;  %v367_v43 = vadd.f32 %v366_v36, %v361_v21  ;;  %v372_v23 = vadd.f32 %v371_v12, %v359_v35 }
  0x8a   :  { %v425_v61 = vsel %vm160_vm7, 1.0, %v955_v26  ;;  %v178_v25 = vadd.f32 %v856_v7, %v813_v63  ;;  %v316_v27 = vadd.f32 %v312_v41, %v891_v59  ;;  %v370_v55 = vadd.f32 %v369_v45, %v362_v22 }
  0x8b   :  { %v375_v30 = vadd.f32 %v374_v19, %v360_v20  ;;  %v179_v31 = vadd.f32 %v863_v28, %v820_v13  ;;  %v373_v42 = vadd.f32 %v372_v23, %v363_v11  ;;  %v377_v62 = vadd.f32 %v367_v43, %v313_v54 }
  0x8c   :  { %v180_v29 = vadd.f32 %v425_v61, %v828_v24  ;;  %v378_v32 = vadd.f32 %v370_v55, %v314_v14  ;;  %vm399_vm8 = vcmask 0  }
  0x8d   :  { %v376_v0 = vadd.f32 %v375_v30, %v364_v17  ;;  %v379_v1 = vadd.f32 %v373_v42, %v315_v53  ;;  %v381_v56 = vmul.f32 %v377_v62, %v858_v18 }
  0x8e   :  { %v382_v38 = vmul.f32 %v378_v32, %v178_v25 }
  0x8f   :  { %v380_v33 = vadd.f32 %v376_v0, %v316_v27  ;;  %v383_v39 = vmul.f32 %v379_v1, %v179_v31 }
  0x90   :  { %v385_v7 = vadd.f32 %v382_v38, %v381_v56 }
  0x91   :  { %v384_v63 = vmul.f32 %v380_v33, %v180_v29 }
  0x92   :  { %v386_v59 = vadd.f32 %v385_v7, %v383_v39 }
  0x94   :  { %v387_v34 = vadd.f32 %v386_v59, %v384_v63 }
  0x96   :  { %388 = vadd.xlane.f32.xlu0 %v387_v34 }
 0x123   :  { %v389_v2 = vpop.xlane.xlu0 %388 }
 0x124   :  { %v390_v47 = vrot.slane %v389_v2, 4 }
 0x126   :  { %v391_v13 = vadd.f32 %v390_v47, %v389_v2 }
 0x128   :  { %v392_v28 = vrot.slane %v391_v13, 2 }
 0x12a   :  { %v393_v48 = vadd.f32 %v392_v28, %v391_v13 }
 0x12c   :  { %v394_v3 = vrot.slane %v393_v48, 1 }
 0x12e   :  { %v395_v24 = vadd.f32 %v394_v3, %v393_v48 }
 0x130   :  { %426 = vpush %v395_v24 }
 0x161   :  { %s427_s6 = spop %426 }
 0x162   :  { %s397_s28 = smul.f32 3.0517578e-05, %s427_s6 }
 0x164   :  { %v398_v18 = vstv %s397_s28 }
 0x165   :  { %400 = vst.msk [vmem:[#allocation11] sm:$0x1] %vm399_vm8, %v398_v18 }
 0x166   :  { %558 = shalt.err (!%p555_p2)
}
 0x167   :  { %s559_s8 = scalar_lea.hbm %s941_s5, 16 }
 0x168   :  { %p560_p3 = scmp.ne.s32.totalorder %s941_s5, %s559_s8  ;;  %p563_p4 = scmp.lt.u32.totalorder %s559_s8, %s941_s5 }
 0x16a   :  { %p565_p5 = pnand %p563_p4, %p560_p3 }
 0x16c   :  { %568 = shalt.err (!%p565_p5)
}
 0x16d   :  { %410 = dma.vmem_to_hbm [thread:$0]  %s408_s30, 16, %s941_s5, [#allocation4]  }
 0x16e   :  { %575 = dma.done.wait [#allocation4], 16  }
 0x16f   :  { %576 = vsyncadd [#allocation4], 4294967280 }
 0x170   :  { %414 = vsyncpa [#allocation3], 1 }
 0x171   :  { %415 = vsyncpa [#allocation6], 1 }
 0x172   :  { %416 = vsyncpa [#allocation9], 1 }
 0x173   :  { %417 = vsyncpa [#allocation4], 1 }

</bundles_post_ra>
